<compile_context>
chip_gen: v5e
topology: v5e:2x2
jax: 0.10.0
libtpu: 0.0.40
codegen_flags: <defaults>
</compile_context>

<pallas_src>
import jax
import jax.numpy as jnp
from jax.experimental import pallas as pl
from jax.experimental.pallas import tpu as pltpu

VEC_SIZE = 512
N_CLASSES = 10
BATCH = 2
L_CONV = (VEC_SIZE - 3) // 2 + 1   # 255  (after Conv1d k=3 s=2)
L_POOL = (L_CONV - 3) // 2 + 1     # 127  (after MaxPool1d k=3 s=2) == Linear in-dim
LANES = 128                        # lane-aligned padded feature / class width
SUBLANES = 8                       # f32 sublane tile
MAX_TB = 512                       # batch tile cap for the gridded path


def classify_kernel(cw_ref, cb_ref, xp_ref, w1_ref, b1_ref, w2_ref, b2_ref, out_ref):
    # Conv weights / bias are scalars in SMEM.
    k0 = cw_ref[0]
    k1 = cw_ref[1]
    k2 = cw_ref[2]
    cb = cb_ref[0]

    # mod-4 de-interleaved planes of x (built in the wrapper), each (TB, 128):
    #   x0[p]=x[4p]  x1[p]=x[4p+1]  x2[p]=x[4p+2]  x3[p]=x[4p+3]
    #   x0s[p]=x[4p+4]  x1s[p]=x[4p+5]  x2s[p]=x[4p+6]   (zero at p=127)
    x0 = xp_ref[0]
    x1 = xp_ref[1]
    x2 = xp_ref[2]
    x3 = xp_ref[3]
    x0s = xp_ref[4]
    x1s = xp_ref[5]
    x2s = xp_ref[6]

    # Conv1d(1,1,k=3,s=2): conv[j] = k0*x[2j] + k1*x[2j+1] + k2*x[2j+2]  (bias hoisted)
    conv_even = k0 * x0 + k1 * x1 + k2 * x2          # conv[2p]
    conv_odd = k0 * x2 + k1 * x3 + k2 * x0s          # conv[2p+1]
    conv_even_nxt = k0 * x0s + k1 * x1s + k2 * x2s   # conv[2p+2]

    # MaxPool1d(k=3,s=2) fused with the bias add and ReLU (both commute with max).
    pooled = jnp.maximum(jnp.maximum(conv_even, conv_odd), conv_even_nxt)
    pooled = jnp.maximum(pooled + cb, 0.0)   # (TB,128); lane 127 is junk, nulled by zero W1 row

    # Linear(127,127) + ReLU, then Linear(127,n_classes), on 128-padded operands (MXU).
    h = jnp.dot(pooled, w1_ref[...], preferred_element_type=jnp.float32) + b1_ref[...]
    h = jnp.maximum(h, 0.0)
    out = jnp.dot(h, w2_ref[...], preferred_element_type=jnp.float32) + b2_ref[...]
    out_ref[...] = out.astype(out_ref.dtype)          # lane-dense (TB, 128) store


def _round_up(n, m):
    return ((n + m - 1) // m) * m


def _forward_impl(x, cw, cb, w1p, b1p, w2p, b2p):
    b = x.shape[0]

    # ---- layout plumbing: mod-4 de-interleave + shift-by-one (fused under jit) ----
    xr = x.reshape(b, LANES, 4)                               # xr[b,p,c] = x[b, 4p+c]
    xs = jnp.pad(xr[:, 1:, :], ((0, 0), (0, 1), (0, 0)))      # xs[b,p,c] = x[b, 4(p+1)+c]
    planes = jnp.concatenate(
        [jnp.moveaxis(xr, -1, 0), jnp.moveaxis(xs, -1, 0)[:3]], axis=0)  # (7, B, 128)

    # ---- pad batch to a full sublane tile / batch tile ----
    tb = SUBLANES if b <= SUBLANES else min(_round_up(b, SUBLANES), MAX_TB)
    bp = _round_up(b, tb)
    if bp > b:
        planes = jnp.pad(planes, ((0, 0), (0, bp - b), (0, 0)))

    out = pl.pallas_call(
        classify_kernel,
        out_shape=jax.ShapeDtypeStruct((bp, LANES), jnp.float32),
        grid=(bp // tb,),
        in_specs=[
            pl.BlockSpec(memory_space=pltpu.MemorySpace.SMEM),        # conv weight (3,)
            pl.BlockSpec(memory_space=pltpu.MemorySpace.SMEM),        # conv bias  (1,)
            pl.BlockSpec((7, tb, LANES), lambda i: (0, i, 0)),        # x planes   (7, TB, 128)
            pl.BlockSpec((LANES, LANES), lambda i: (0, 0)),           # W1 padded  (VMEM-resident)
            pl.BlockSpec((1, LANES), lambda i: (0, 0)),               # b1 padded
            pl.BlockSpec((LANES, LANES), lambda i: (0, 0)),           # W2 padded  (VMEM-resident)
            pl.BlockSpec((1, LANES), lambda i: (0, 0)),               # b2 padded
        ],
        out_specs=pl.BlockSpec((tb, LANES), lambda i: (i, 0)),
        compiler_params=pltpu.CompilerParams(
            dimension_semantics=("parallel",)),
    )(cw, cb, planes, w1p, b1p, w2p, b2p)

    return out[:b, :N_CLASSES]   # drop batch / class padding


_classify_jit = jax.jit(_forward_impl)


def classify_forward(x, padded_params, labels=None, epo=()):
    """Matches classify.forward(x, labels, epo) on the eval path."""
    # TODO(synk): 'train_lst' in epo branch (host-side arr_tsne accumulation + print) omitted.
    del labels, epo
    cw, cb, w1p, b1p, w2p, b2p = padded_params
    return _classify_jit(x, cw, cb, w1p, b1p, w2p, b2p)


def prepare_params(params):
    """One-time (hoisted) padding of parameters to lane-aligned 128-wide tiles.

    Invariant: W1 rows/cols >= 127 and W2 rows >= 127 / cols >= n_classes are
    exactly zero, so the junk lane 127 of the pooled activations never leaks.
    """
    cw, cb, w1, b1, w2, b2 = params
    w1p = jnp.zeros((LANES, LANES), jnp.float32).at[:L_POOL, :L_POOL].set(w1)
    b1p = jnp.zeros((1, LANES), jnp.float32).at[:, :L_POOL].set(b1)
    w2p = jnp.zeros((LANES, LANES), jnp.float32).at[:L_POOL, :N_CLASSES].set(w2)
    b2p = jnp.zeros((1, LANES), jnp.float32).at[:, :N_CLASSES].set(b2)
    return (jnp.asarray(cw, jnp.float32), jnp.asarray(cb, jnp.float32),
            w1p, b1p, w2p, b2p)


def init_params(key):
    """Deterministic synthetic parameters with the module's shapes."""
    k0, k1, k2, k3, k4, k5 = jax.random.split(key, 6)
    cw = jax.random.uniform(k0, (3,), jnp.float32, -0.5, 0.5)            # Conv1d weight (1,1,3)
    cb = jax.random.uniform(k1, (1,), jnp.float32, -0.5, 0.5)            # Conv1d bias
    w1 = jax.random.uniform(k2, (L_POOL, L_POOL), jnp.float32, -0.08, 0.08)     # linear_1.weight.T
    b1 = jax.random.uniform(k3, (1, L_POOL), jnp.float32, -0.08, 0.08)          # linear_1.bias
    w2 = jax.random.uniform(k4, (L_POOL, N_CLASSES), jnp.float32, -0.08, 0.08)  # linear.weight.T
    b2 = jax.random.uniform(k5, (1, N_CLASSES), jnp.float32, -0.08, 0.08)       # linear.bias
    return cw, cb, w1, b1, w2, b2


def reference_forward(x, params):
    """Pure-JAX reference of the PyTorch forward (eval path)."""
    cw, cb, w1, b1, w2, b2 = params
    xa = x[:, 0:2 * L_CONV:2][:, :L_CONV]
    xb = x[:, 1:1 + 2 * L_CONV:2][:, :L_CONV]
    xc = x[:, 2:2 + 2 * L_CONV:2][:, :L_CONV]
    conv = jnp.maximum(cw[0] * xa + cw[1] * xb + cw[2] * xc + cb[0], 0.0)
    pa = conv[:, 0:2 * L_POOL:2][:, :L_POOL]
    pb = conv[:, 1:1 + 2 * L_POOL:2][:, :L_POOL]
    pc = conv[:, 2:2 + 2 * L_POOL:2][:, :L_POOL]
    pooled = jnp.maximum(jnp.maximum(pa, pb), pc)
    h = jnp.maximum(pooled @ w1 + b1, 0.0)
    return h @ w2 + b2


if __name__ == "__main__":
    key = jax.random.PRNGKey(0)
    kx, kp, kl = jax.random.split(key, 3)
    x = jax.random.normal(kx, (BATCH, VEC_SIZE), jnp.float32)
    labels = jax.random.randint(kl, (BATCH,), 0, N_CLASSES)   # unused on eval path
    raw_params = init_params(kp)

    # Hoisted, one-time parameter padding (not on the per-call path).
    padded_params = jax.block_until_ready(prepare_params(raw_params))

    out = classify_forward(x, padded_params, labels=labels, epo="eval")
    out = jax.block_until_ready(out)

    ref = reference_forward(x, raw_params)
    assert out.shape == (BATCH, N_CLASSES)
    assert jnp.allclose(out, ref, atol=1e-4, rtol=1e-4), "mismatch vs JAX reference"
    print("KERNEL_OK")
</pallas_src>

<mosaic_0001>
module attributes {stable_mosaic.version = 11 : i64} {
  func.func @classify_kernel(%arg0: i32, %arg1: memref<3xf32, #tpu.memory_space<smem>>, %arg2: memref<1xf32, #tpu.memory_space<smem>>, %arg3: memref<7x8x128xf32, #tpu.memory_space<vmem>>, %arg4: memref<128x128xf32, #tpu.memory_space<vmem>>, %arg5: memref<1x128xf32, #tpu.memory_space<vmem>>, %arg6: memref<128x128xf32, #tpu.memory_space<vmem>>, %arg7: memref<1x128xf32, #tpu.memory_space<vmem>>, %arg8: memref<8x128xf32, #tpu.memory_space<vmem>>) attributes {dimension_semantics = [#tpu.dimension_semantics<parallel>], iteration_bounds = array<i64: 1>, scalar_prefetch = 0 : i64, scratch_operands = 0 : i64, tpu.core_type = #tpu.core_type<tc>, window_params = [{transform_indices = @transform_0, window_bounds = array<i64: 3>}, {transform_indices = @transform_1, window_bounds = array<i64: 1>}, {transform_indices = @transform_2, window_bounds = array<i64: 7, 8, 128>}, {pipeline_mode = #tpu.pipeline_mode<synchronous>, transform_indices = @transform_3, window_bounds = array<i64: 128, 128>}, {pipeline_mode = #tpu.pipeline_mode<synchronous>, transform_indices = @transform_4, window_bounds = array<i64: 1, 128>}, {pipeline_mode = #tpu.pipeline_mode<synchronous>, transform_indices = @transform_5, window_bounds = array<i64: 128, 128>}, {pipeline_mode = #tpu.pipeline_mode<synchronous>, transform_indices = @transform_6, window_bounds = array<i64: 1, 128>}, {transform_indices = @transform_7, window_bounds = array<i64: 8, 128>}]} {
    %c0 = arith.constant 0 : index
    %0 = memref.load %arg1[%c0] : memref<3xf32, #tpu.memory_space<smem>>
    %c1 = arith.constant 1 : index
    %1 = memref.load %arg1[%c1] : memref<3xf32, #tpu.memory_space<smem>>
    %c2 = arith.constant 2 : index
    %2 = memref.load %arg1[%c2] : memref<3xf32, #tpu.memory_space<smem>>
    %c0_0 = arith.constant 0 : index
    %3 = memref.load %arg2[%c0_0] : memref<1xf32, #tpu.memory_space<smem>>
    %c0_1 = arith.constant 0 : index
    %c0_2 = arith.constant 0 : index
    %c0_3 = arith.constant 0 : index
    %4 = vector.load %arg3[%c0_1, %c0_2, %c0_3] : memref<7x8x128xf32, #tpu.memory_space<vmem>>, vector<1x8x128xf32>
    %5 = vector.shape_cast %4 : vector<1x8x128xf32> to vector<8x128xf32>
    %c1_4 = arith.constant 1 : index
    %c0_5 = arith.constant 0 : index
    %c0_6 = arith.constant 0 : index
    %6 = vector.load %arg3[%c1_4, %c0_5, %c0_6] : memref<7x8x128xf32, #tpu.memory_space<vmem>>, vector<1x8x128xf32>
    %7 = vector.shape_cast %6 : vector<1x8x128xf32> to vector<8x128xf32>
    %c2_7 = arith.constant 2 : index
    %c0_8 = arith.constant 0 : index
    %c0_9 = arith.constant 0 : index
    %8 = vector.load %arg3[%c2_7, %c0_8, %c0_9] : memref<7x8x128xf32, #tpu.memory_space<vmem>>, vector<1x8x128xf32>
    %9 = vector.shape_cast %8 : vector<1x8x128xf32> to vector<8x128xf32>
    %c3 = arith.constant 3 : index
    %c0_10 = arith.constant 0 : index
    %c0_11 = arith.constant 0 : index
    %10 = vector.load %arg3[%c3, %c0_10, %c0_11] : memref<7x8x128xf32, #tpu.memory_space<vmem>>, vector<1x8x128xf32>
    %11 = vector.shape_cast %10 : vector<1x8x128xf32> to vector<8x128xf32>
    %c4 = arith.constant 4 : index
    %c0_12 = arith.constant 0 : index
    %c0_13 = arith.constant 0 : index
    %12 = vector.load %arg3[%c4, %c0_12, %c0_13] : memref<7x8x128xf32, #tpu.memory_space<vmem>>, vector<1x8x128xf32>
    %13 = vector.shape_cast %12 : vector<1x8x128xf32> to vector<8x128xf32>
    %c5 = arith.constant 5 : index
    %c0_14 = arith.constant 0 : index
    %c0_15 = arith.constant 0 : index
    %14 = vector.load %arg3[%c5, %c0_14, %c0_15] : memref<7x8x128xf32, #tpu.memory_space<vmem>>, vector<1x8x128xf32>
    %15 = vector.shape_cast %14 : vector<1x8x128xf32> to vector<8x128xf32>
    %c6 = arith.constant 6 : index
    %c0_16 = arith.constant 0 : index
    %c0_17 = arith.constant 0 : index
    %16 = vector.load %arg3[%c6, %c0_16, %c0_17] : memref<7x8x128xf32, #tpu.memory_space<vmem>>, vector<1x8x128xf32>
    %17 = vector.shape_cast %16 : vector<1x8x128xf32> to vector<8x128xf32>
    %18 = vector.broadcast %0 : f32 to vector<8x128xf32>
    %19 = arith.mulf %18, %5 : vector<8x128xf32>
    %20 = vector.broadcast %1 : f32 to vector<8x128xf32>
    %21 = arith.mulf %20, %7 : vector<8x128xf32>
    %22 = arith.addf %19, %21 : vector<8x128xf32>
    %23 = vector.broadcast %2 : f32 to vector<8x128xf32>
    %24 = arith.mulf %23, %9 : vector<8x128xf32>
    %25 = arith.addf %22, %24 : vector<8x128xf32>
    %26 = vector.broadcast %0 : f32 to vector<8x128xf32>
    %27 = arith.mulf %26, %9 : vector<8x128xf32>
    %28 = vector.broadcast %1 : f32 to vector<8x128xf32>
    %29 = arith.mulf %28, %11 : vector<8x128xf32>
    %30 = arith.addf %27, %29 : vector<8x128xf32>
    %31 = vector.broadcast %2 : f32 to vector<8x128xf32>
    %32 = arith.mulf %31, %13 : vector<8x128xf32>
    %33 = arith.addf %30, %32 : vector<8x128xf32>
    %34 = vector.broadcast %0 : f32 to vector<8x128xf32>
    %35 = arith.mulf %34, %13 : vector<8x128xf32>
    %36 = vector.broadcast %1 : f32 to vector<8x128xf32>
    %37 = arith.mulf %36, %15 : vector<8x128xf32>
    %38 = arith.addf %35, %37 : vector<8x128xf32>
    %39 = vector.broadcast %2 : f32 to vector<8x128xf32>
    %40 = arith.mulf %39, %17 : vector<8x128xf32>
    %41 = arith.addf %38, %40 : vector<8x128xf32>
    %42 = arith.maximumf %25, %33 : vector<8x128xf32>
    %43 = arith.maximumf %42, %41 : vector<8x128xf32>
    %44 = vector.broadcast %3 : f32 to vector<8x128xf32>
    %45 = arith.addf %43, %44 : vector<8x128xf32>
    %cst = arith.constant 0.000000e+00 : f32
    %46 = vector.broadcast %cst : f32 to vector<8x128xf32>
    %47 = arith.maximumf %45, %46 : vector<8x128xf32>
    %c0_18 = arith.constant 0 : index
    %c0_19 = arith.constant 0 : index
    %48 = vector.load %arg4[%c0_18, %c0_19] : memref<128x128xf32, #tpu.memory_space<vmem>>, vector<128x128xf32>
    %cst_20 = arith.constant dense<0.000000e+00> : vector<8x128xf32>
    %49 = tpu.matmul %47, %48, %cst_20 {dimension_numbers = #tpu.dot_dimension_numbers<[1], [0], [0], [1], [0, 0, 1, 1], [], []>} : vector<8x128xf32>, vector<128x128xf32>, vector<8x128xf32> -> vector<8x128xf32>
    %c0_21 = arith.constant 0 : index
    %c0_22 = arith.constant 0 : index
    %50 = vector.load %arg5[%c0_21, %c0_22] : memref<1x128xf32, #tpu.memory_space<vmem>>, vector<1x128xf32>
    %51 = vector.broadcast %50 : vector<1x128xf32> to vector<8x128xf32>
    %52 = arith.addf %49, %51 : vector<8x128xf32>
    %cst_23 = arith.constant 0.000000e+00 : f32
    %53 = vector.broadcast %cst_23 : f32 to vector<8x128xf32>
    %54 = arith.maximumf %52, %53 : vector<8x128xf32>
    %c0_24 = arith.constant 0 : index
    %c0_25 = arith.constant 0 : index
    %55 = vector.load %arg6[%c0_24, %c0_25] : memref<128x128xf32, #tpu.memory_space<vmem>>, vector<128x128xf32>
    %cst_26 = arith.constant dense<0.000000e+00> : vector<8x128xf32>
    %56 = tpu.matmul %54, %55, %cst_26 {dimension_numbers = #tpu.dot_dimension_numbers<[1], [0], [0], [1], [0, 0, 1, 1], [], []>} : vector<8x128xf32>, vector<128x128xf32>, vector<8x128xf32> -> vector<8x128xf32>
    %c0_27 = arith.constant 0 : index
    %c0_28 = arith.constant 0 : index
    %57 = vector.load %arg7[%c0_27, %c0_28] : memref<1x128xf32, #tpu.memory_space<vmem>>, vector<1x128xf32>
    %58 = vector.broadcast %57 : vector<1x128xf32> to vector<8x128xf32>
    %59 = arith.addf %56, %58 : vector<8x128xf32>
    %c0_29 = arith.constant 0 : index
    %c0_30 = arith.constant 0 : index
    %60 = vector.load %arg8[%c0_29, %c0_30] : memref<8x128xf32, #tpu.memory_space<vmem>>, vector<8x128xf32>
    tpu.vector_store %arg8[%c0_29, %c0_30], %59 {strides = array<i32>} : memref<8x128xf32, #tpu.memory_space<vmem>>, vector<8x128xf32>,
    return
  }
  func.func @transform_0(%arg0: i32) -> i32 {
    %c0_i32 = arith.constant 0 : i32
    %c0_i32_0 = arith.constant 0 : i32
    return %c0_i32 : i32
  }
  func.func @transform_1(%arg0: i32) -> i32 {
    %c0_i32 = arith.constant 0 : i32
    %c0_i32_0 = arith.constant 0 : i32
    return %c0_i32 : i32
  }
  func.func @transform_2(%arg0: i32) -> (i32, i32, i32) {
    %c0_i32 = arith.constant 0 : i32
    %c0_i32_0 = arith.constant 0 : i32
    %c0_i32_1 = arith.constant 0 : i32
    return %c0_i32, %arg0, %c0_i32_0 : i32, i32, i32
  }
  func.func @transform_3(%arg0: i32) -> (i32, i32) {
    %c0_i32 = arith.constant 0 : i32
    %c0_i32_0 = arith.constant 0 : i32
    %c0_i32_1 = arith.constant 0 : i32
    return %c0_i32, %c0_i32_0 : i32, i32
  }
  func.func @transform_4(%arg0: i32) -> (i32, i32) {
    %c0_i32 = arith.constant 0 : i32
    %c0_i32_0 = arith.constant 0 : i32
    %c0_i32_1 = arith.constant 0 : i32
    return %c0_i32, %c0_i32_0 : i32, i32
  }
  func.func @transform_5(%arg0: i32) -> (i32, i32) {
    %c0_i32 = arith.constant 0 : i32
    %c0_i32_0 = arith.constant 0 : i32
    %c0_i32_1 = arith.constant 0 : i32
    return %c0_i32, %c0_i32_0 : i32, i32
  }
  func.func @transform_6(%arg0: i32) -> (i32, i32) {
    %c0_i32 = arith.constant 0 : i32
    %c0_i32_0 = arith.constant 0 : i32
    %c0_i32_1 = arith.constant 0 : i32
    return %c0_i32, %c0_i32_0 : i32, i32
  }
  func.func @transform_7(%arg0: i32) -> (i32, i32) {
    %c0_i32 = arith.constant 0 : i32
    %c0_i32_0 = arith.constant 0 : i32
    return %arg0, %c0_i32 : i32, i32
  }
}

</mosaic_0001>

<bundles_post_ra>
// kernel: _forward_impl.1
= control target key start
LH: loop header
LB: loop body
LE: loop exit
PB: predicated region body
PF: predicated region fallthrough
CT: control target
= control target key end

     0   :  { %13 = vsyncpa [#allocation4], 0  ;;  %s192_s27 = smov [#allocation3]   ;;  %s365_s0 = inlined_call_operand.vmem [shape: f32[3], index: 0, kind: input, shape index: {}]   ;;  %s366_s1 = inlined_call_operand.<no memory space> [shape: f32[1], index: 1, kind: input, shape index: {}]   ;;  %s367_s2 = inlined_call_operand.vmem [shape: f32[7,8,128], index: 2, kind: input, shape index: {}]   ;;  %s368_s3 = inlined_call_operand.vmem [shape: f32[128,128], index: 3, kind: input, shape index: {}]   ;;  %s369_s4 = inlined_call_operand.vmem [shape: f32[1,128], index: 4, kind: input, shape index: {}]   ;;  %s370_s5 = inlined_call_operand.vmem [shape: f32[128,128], index: 5, kind: input, shape index: {}]   ;;  %s371_s6 = inlined_call_operand.vmem [shape: f32[1,128], index: 6, kind: input, shape index: {}]   ;;  %s372_s7 = inlined_call_operand.vmem [shape: f32[8,128], index: 7, kind: output, shape index: {}]  }
   0x1   :  { %s19_s26 = sshll.u32 %s365_s0, 4  ;;  %s20_s26 = int_to_ptr.vmem [resolvable:$true] %s19_s26 }
   0x2   :  { %22 = dma.vmem_to_smem %s20_s26, 16, %s192_s27, [#allocation4]  }
   0x3   :  { %190 = dma.done.wait [#allocation4], 16  }
   0x4   :  { %191 = vsyncadd [#allocation4], 4294967280 }
   0x5   :  { %39 = sfence }
   0x6   :  { %v95_v0 = vld [vmem:[%s368_s3 + $0x78] sm:$0xff]  ;;  %v94_v1 = vld [vmem:[%s368_s3 + $0x70] sm:$0xff]  ;;  %s40_s9 = sld [smem:[#allocation3]]  ;;  %v93_v2 = vld [vmem:[%s368_s3 + $0x68] sm:$0xff]  ;;  %v77_v47 = vstv %s366_s1 }
   0x7   :  { %100 = vmatpush.msra.mxu0 %v95_v0  ;;  %s167_s10 = sld [smem:[#allocation3 + $0x1]]  ;;  %v92_v3 = vld [vmem:[%s368_s3 + $0x60] sm:$0xff]  ;;  %v91_v4 = vld [vmem:[%s368_s3 + $0x58] sm:$0xff]  ;;  %v169_v6 = vld [vmem:[%s367_s2 + $0x8] sm:$0xff] }
   0x8   :  { %s168_s0 = sld [smem:[#allocation3 + $0x2]]  ;;  %v44_v5 = vld [vmem:[%s367_s2] sm:$0xff]  ;;  %v170_v7 = vld [vmem:[%s367_s2 + $0x10] sm:$0xff]  ;;  %v171_v8 = vld [vmem:[%s367_s2 + $0x18] sm:$0xff] }
   0x9   :  { %101 = vmatpush.msra.mxu0 %v94_v1  ;;  %v172_v9 = vld [vmem:[%s367_s2 + $0x20] sm:$0xff]  ;;  %v173_v11 = vld [vmem:[%s367_s2 + $0x28] sm:$0xff]  ;;  %v136_v16 = vld [vmem:[%s370_s5 + $0x78] sm:$0xff] }
   0xa   :  { %v90_v17 = vld [vmem:[%s368_s3 + $0x50] sm:$0xff]  ;;  %141 = vmatpush.msra.mxu1 %v136_v16  ;;  %v134_v26 = vld [vmem:[%s370_s5 + $0x68] sm:$0xff]  ;;  %v133_v30 = vld [vmem:[%s370_s5 + $0x60] sm:$0xff] }
   0xb   :  { %102 = vmatpush.msra.mxu0 %v93_v2  ;;  %v135_v22 = vld [vmem:[%s370_s5 + $0x70] sm:$0xff]  ;;  %v89_v27 = vld [vmem:[%s368_s3 + $0x48] sm:$0xff]  ;;  %v88_v31 = vld [vmem:[%s368_s3 + $0x40] sm:$0xff] }
   0xc   :  { %v57_v10 = vstv %s40_s9  ;;  %v174_v23 = vld [vmem:[%s367_s2 + $0x30] sm:$0xff]  ;;  %142 = vmatpush.msra.mxu1 %v135_v22  ;;  %v132_v36 = vld [vmem:[%s370_s5 + $0x58] sm:$0xff]  ;;  %v130_v42 = vld [vmem:[%s370_s5 + $0x48] sm:$0xff] }
   0xd   :  { %103 = vmatpush.msra.mxu0 %v92_v3  ;;  %v58_v12 = vmul.f32 %v57_v10, %v44_v5  ;;  %v59_v13 = vstv %s167_s10  ;;  %v65_v14 = vmul.f32 %v170_v7, %v57_v10  ;;  %v70_v15 = vmul.f32 %v172_v9, %v57_v10  ;;  %v87_v37 = vld [vmem:[%s368_s3 + $0x38] sm:$0xff]  ;;  %v131_v38 = vld [vmem:[%s370_s5 + $0x50] sm:$0xff]  ;;  %v85_v43 = vld [vmem:[%s368_s3 + $0x28] sm:$0xff] }
   0xe   :  { %v60_v18 = vmul.f32 %v169_v6, %v59_v13  ;;  %v62_v19 = vstv %s168_s0  ;;  %v66_v20 = vmul.f32 %v171_v8, %v59_v13  ;;  %v71_v21 = vmul.f32 %v173_v11, %v59_v13  ;;  %143 = vmatpush.msra.mxu1 %v134_v26  ;;  %v86_v39 = vld [vmem:[%s368_s3 + $0x30] sm:$0xff]  ;;  %v129_v44 = vld [vmem:[%s370_s5 + $0x40] sm:$0xff]  ;;  %v128_v48 = vld [vmem:[%s370_s5 + $0x38] sm:$0xff] }
   0xf   :  { %104 = vmatpush.msra.mxu0 %v91_v4  ;;  %v63_v24 = vmul.f32 %v170_v7, %v62_v19  ;;  %v68_v25 = vmul.f32 %v172_v9, %v62_v19  ;;  %v73_v35 = vmul.f32 %v174_v23, %v62_v19  ;;  %v84_v45 = vld [vmem:[%s368_s3 + $0x20] sm:$0xff]  ;;  %v83_v49 = vld [vmem:[%s368_s3 + $0x18] sm:$0xff]  ;;  %v127_v50 = vld [vmem:[%s370_s5 + $0x30] sm:$0xff] }
  0x10   :  { %v61_v28 = vadd.f32 %v60_v18, %v58_v12  ;;  %v67_v29 = vadd.f32 %v66_v20, %v65_v14  ;;  %v72_v34 = vadd.f32 %v71_v21, %v70_v15  ;;  %144 = vmatpush.msra.mxu1 %v133_v30  ;;  %v82_v51 = vld [vmem:[%s368_s3 + $0x10] sm:$0xff]  ;;  %v126_v53 = vld [vmem:[%s370_s5 + $0x28] sm:$0xff]  ;;  %v125_v55 = vld [vmem:[%s370_s5 + $0x20] sm:$0xff] }
  0x11   :  { %105 = vmatpush.msra.mxu0 %v90_v17  ;;  %v81_v54 = vld [vmem:[%s368_s3 + $0x8] sm:$0xff]  ;;  %v80_v56 = vld [vmem:[%s368_s3] sm:$0xff]  ;;  %v124_v58 = vld [vmem:[%s370_s5 + $0x18] sm:$0xff] }
  0x12   :  { %v64_v32 = vadd.f32 %v63_v24, %v61_v28  ;;  %v69_v33 = vadd.f32 %v68_v25, %v67_v29  ;;  %v74_v40 = vadd.f32 %v73_v35, %v72_v34  ;;  %145 = vmatpush.msra.mxu1 %v132_v36  ;;  %v123_v59 = vld [vmem:[%s370_s5 + $0x10] sm:$0xff]  ;;  %v122_v60 = vld [vmem:[%s370_s5 + $0x8] sm:$0xff]  ;;  %v121_v61 = vld [vmem:[%s370_s5] sm:$0xff] }
  0x13   :  { %106 = vmatpush.msra.mxu0 %v89_v27  ;;  %v176_v62 = vld [vmem:[%s369_s4] ss:$0 sm:$0xff] }
  0x14   :  { %v75_v41 = vmax.f32 %v64_v32, %v69_v33  ;;  %146 = vmatpush.msra.mxu1 %v131_v38  ;;  %v177_v2 = vld [vmem:[%s371_s6] ss:$0 sm:$0xff] }
  0x15   :  { %107 = vmatpush.msra.mxu0 %v88_v31 }
  0x16   :  { %v76_v46 = vmax.f32 %v75_v41, %v74_v40  ;;  %147 = vmatpush.msra.mxu1 %v130_v42 }
  0x17   :  { %108 = vmatpush.msra.mxu0 %v87_v37 }
  0x18   :  { %148 = vmatpush.msra.mxu1 %v129_v44  ;;  %v78_v52 = vadd.f32 %v77_v47, %v76_v46 }
  0x19   :  { %109 = vmatpush.msra.mxu0 %v86_v39 }
  0x1a   :  { %149 = vmatpush.msra.mxu1 %v128_v48  ;;  %v79_v57 = vmax.f32 %v78_v52, 0.0 }
  0x1b   :  { %110 = vmatpush.msra.mxu0 %v85_v43 }
  0x1c   :  { %150 = vmatpush.msra.mxu1 %v127_v50 }
  0x1d   :  { %111 = vmatpush.msra.mxu0 %v84_v45 }
  0x1e   :  { %151 = vmatpush.msra.mxu1 %v126_v53 }
  0x1f   :  { %112 = vmatpush.msra.mxu0 %v83_v49 }
  0x20   :  { %152 = vmatpush.msra.mxu1 %v125_v55 }
  0x21   :  { %113 = vmatpush.msra.mxu0 %v82_v51 }
  0x22   :  { %153 = vmatpush.msra.mxu1 %v124_v58 }
  0x23   :  { %114 = vmatpush.msra.mxu0 %v81_v54 }
  0x24   :  { %154 = vmatpush.msra.mxu1 %v123_v59 }
  0x25   :  { %115 = vmatpush.msra.mxu0 %v80_v56 }
  0x26   :  { %116 = vmatmul.f32.vlgmr.msra.gmra.mxu0 %v79_v57  ;;  %155 = vmatpush.msra.mxu1 %v122_v60 }
  0x28   :  { %156 = vmatpush.msra.mxu1 %v121_v61 }
  0xa3   :  { %v117_v63 = vpop.f32.mrf.mxu0 }
  0xa4   :  { %v118_v0 = vadd.f32 %v176_v62, %v117_v63 }
  0xa6   :  { %v120_v1 = vmax.f32 %v118_v0, 0.0 }
  0xa8   :  { %157 = vmatmul.f32.vlgmr.msra.gmra.mxu1 %v120_v1 }
 0x125   :  { %v158_v3 = vpop.f32.mrf.mxu1 }
 0x126   :  { %v159_v4 = vadd.f32 %v177_v2, %v158_v3 }
 0x128   :  { %161 = vst [vmem:[%s372_s7] sm:$0xff] %v159_v4 }
 0x129   :  { %166 = vsyncpa [#allocation4], 1 }

</bundles_post_ra>
